<compile_context>
chip_gen: v5e
topology: v5e:2x2
jax: 0.10.0
libtpu: 0.0.40
codegen_flags: <defaults>
</compile_context>

<pallas_src>
import functools

import jax
import jax.numpy as jnp
from jax.experimental import pallas as pl
from jax.experimental.pallas import tpu as pltpu

_LANE = 128
_SUBLANE = 8  # f32 accumulator sublane granularity


def _round_up(a, m):
    return ((a + m - 1) // m) * m


def _elementwise_loss(loss_type: str, x, y):
    """Matches torch.nn.{MSELoss,L1Loss,SmoothL1Loss,BCEWithLogitsLoss}(reduction='none')."""
    d = x - y
    if loss_type == "mse":
        return d * d
    if loss_type == "l1":
        return jnp.abs(d)
    if loss_type == "smooth_l1":
        beta = 1.0
        ad = jnp.abs(d)
        return jnp.where(ad < beta, 0.5 * d * d / beta, ad - 0.5 * beta)
    if loss_type == "bce":
        # BCEWithLogitsLoss: max(x,0) - x*y + log(1 + exp(-|x|))
        return jnp.maximum(x, 0.0) - x * y + jnp.log1p(jnp.exp(-jnp.abs(x)))
    raise ValueError(f"Unsupported loss function: {loss_type}")


def _weighted_loss_kernel(loss_type, group_rows, step_axis, num_steps,
                          preds_ref, targets_ref, out_ref, acc_ref):
    """One grid step: accumulate the per-sample partial sums of the elementwise loss
    over a (B, tr, 128) block into a (B, 8, 128) f32 scratch, strip-mined in
    `group_rows`-row chunks.  The partial slab is written on the last step."""
    t = pl.program_id(step_axis)

    @pl.when(t == 0)
    def _():
        acc_ref[...] = jnp.zeros_like(acc_ref)

    b, tr, _ = preds_ref.shape
    n_groups = tr // group_rows

    def accum(x_slab, y_slab):
        x = x_slab.astype(jnp.float32)
        y = y_slab.astype(jnp.float32)
        ew = _elementwise_loss(loss_type, x, y)
        g = ew.shape[1]
        # Pure VPU vreg adds: fold g rows into 8 dense sublanes per sample.
        acc_ref[...] += jnp.sum(ew.reshape(b, g // _SUBLANE, _SUBLANE, _LANE), axis=1)

    if n_groups == 1:
        accum(preds_ref[...], targets_ref[...])
    else:
        # Strip-mine to bound live ranges (no whole-block intermediate).
        @pl.loop(0, n_groups)
        def _(k):
            off = pl.multiple_of(k * group_rows, group_rows)
            accum(preds_ref[:, pl.ds(off, group_rows), :],
                  targets_ref[:, pl.ds(off, group_rows), :])

    @pl.when(t == num_steps - 1)
    def _():
        out_ref[...] = acc_ref[...].reshape(out_ref.shape)


def _detect_tpu_info():
    """Best-effort (vmem_capacity_bytes, num_tensorcores).  Safe fallbacks."""
    vmem_cap = 64 << 20  # conservative default = v7x per-core VMEM
    cores = 1
    try:
        info = pltpu.get_tpu_info()
        cap = getattr(info, "vmem_capacity_bytes", None)
        if isinstance(cap, int) and cap > 0:
            vmem_cap = cap
        for name in ("num_cores", "num_tensorcores", "tensorcores_per_chip",
                     "cores_per_chip", "core_count"):
            v = getattr(info, name, None)
            if isinstance(v, int) and v > 0:
                cores = v
                break
    except Exception:
        pass
    if cores == 1:
        try:
            v = getattr(jax.devices()[0], "num_cores", None)
            if isinstance(v, int) and v > 0:
                cores = v
        except Exception:
            pass
    return vmem_cap, min(max(cores, 1), 2)


def weighted_loss(preds, targets, weights=None, *, base_loss_fn_str="mse",
                  target_block_bytes=None, num_parallel=None):
    """Pallas implementation of WeightedLoss(base_loss_fn_str)(preds, targets, weights)."""
    if base_loss_fn_str not in ("mse", "l1", "smooth_l1", "bce"):
        raise ValueError(f"Unsupported loss function: {base_loss_fn_str}")

    b = preds.shape[0] if preds.ndim >= 1 else 1
    p2 = preds.reshape(b, -1)          # contiguous reshape: keeps dtype, no HBM copy
    t2 = targets.reshape(b, -1)
    f = p2.shape[1]

    itemsize = jnp.dtype(p2.dtype).itemsize
    # Dtype-native sublane packing: 8 rows for 4-byte, 16 for bf16, 32 for int8/fp8.
    sub = max(_SUBLANE, 32 // max(itemsize, 1))
    r = max(pl.cdiv(f, _LANE), 1)
    r_sub = _round_up(r, sub)

    # Strip-mine group size (~32 rows), multiple of the packed-sublane count, capped
    # so tiny inputs keep the minimal sublane-aligned footprint.
    g = min(max(sub, 4 * _SUBLANE), r_sub)

    vmem_cap, n_cores = _detect_tpu_info()

    if target_block_bytes is None:
        # v7x (multi-TC, 3.2 TB/s HBM): bigger blocks amortize the ~0.35us/step cost.
        # Single-TC v5e/v6e: 4 MiB/input is already ~roofline.
        target_block_bytes = (8 << 20) if n_cores > 1 else (4 << 20)
    target_block_bytes = max(int(target_block_bytes), g * b * _LANE * itemsize)

    bytes_per_row = b * _LANE * itemsize
    tr = max(g, (target_block_bytes // bytes_per_row) // g * g)
    tr = min(tr, _round_up(r_sub, g))

    # Generation-aware VMEM budget: capacity minus ~16 MiB headroom; shrink the tile
    # (never below one group) instead of failing to compile for large B.
    budget = max(vmem_cap - (16 << 20), 16 << 20)
    out_blk_bytes = b * _SUBLANE * _LANE * 4

    def footprint(tr_):
        blk = b * tr_ * _LANE * itemsize
        return 2 * 2 * blk + 2 * out_blk_bytes + out_blk_bytes + (2 << 20)

    while footprint(tr) > budget and tr > g:
        tr = max(g, (tr // 2) // g * g)
    # TODO(synk): for very large batch (b*4KiB accumulator + b-wide blocks exceeding
    # VMEM even at tr==g), add a batch grid axis instead of shrinking tr further.

    nb = pl.cdiv(r_sub, tr)

    # Parallel split across TensorCores: only on detected multi-TC chips (v7x) and
    # only when there is enough work; single-TC v5e/v6e keep a flat loop.
    if num_parallel is None:
        np_eff = n_cores if (n_cores > 1 and nb >= 4 * n_cores) else 1
    else:
        np_eff = max(1, min(int(num_parallel), nb))
    if np_eff > 1:
        nb = _round_up(nb, np_eff)        # exact rectangular coverage, no clamping
        steps = nb // np_eff
    else:
        np_eff = 1
        steps = nb

    # Pad rows (with zeros) so the grid tiles the array exactly.  Common aligned
    # case: no pad.  The pad's constant contribution is removed in the epilogue.
    r_pad = nb * tr
    f_pad = r_pad * _LANE
    if f_pad != f:
        p2 = jnp.pad(p2, ((0, 0), (0, f_pad - f)))
        t2 = jnp.pad(t2, ((0, 0), (0, f_pad - f)))
    p3 = p2.reshape(b, r_pad, _LANE)
    t3 = t2.reshape(b, r_pad, _LANE)

    vmem_limit = int(min(budget, max(footprint(tr), 32 << 20)))

    if np_eff == 1:
        grid = (steps,)
        in_map = lambda t: (0, t, 0)
        out_map = lambda t: (0, 0, 0, 0)
        dim_sem = ("arbitrary",)
        step_axis = 0
    else:
        grid = (np_eff, steps)
        in_map = lambda p, t: (0, p * steps + t, 0)
        out_map = lambda p, t: (p, 0, 0, 0)
        # CORE_PARALLEL actually shards the leading axis across TensorCores.
        dim_sem = (getattr(pltpu, "CORE_PARALLEL", pltpu.PARALLEL), pltpu.ARBITRARY)
        step_axis = 1

    kernel = functools.partial(_weighted_loss_kernel, base_loss_fn_str, g,
                               step_axis, steps)

    partials = pl.pallas_call(
        kernel,
        out_shape=jax.ShapeDtypeStruct((np_eff, b, _SUBLANE, _LANE), jnp.float32),
        grid_spec=pltpu.PrefetchScalarGridSpec(
            num_scalar_prefetch=0,
            grid=grid,
            in_specs=[pl.BlockSpec((b, tr, _LANE), in_map),
                      pl.BlockSpec((b, tr, _LANE), in_map)],
            out_specs=pl.BlockSpec((1, b, _SUBLANE, _LANE), out_map),
            scratch_shapes=[pltpu.VMEM((b, _SUBLANE, _LANE), jnp.float32)],
        ),
        compiler_params=pltpu.CompilerParams(
            dimension_semantics=dim_sem,
            vmem_limit_bytes=vmem_limit,
        ),
    )(p3, t3)

    # Tiny epilogue in plain JAX: cross-lane/sublane reduce, pad correction,
    # per-sample mean, weighting, batch mean.
    per_sample_sum = jnp.sum(partials, axis=(0, 2, 3))          # (B,)
    pad_count = f_pad - f
    if pad_count:
        z = jnp.zeros((), jnp.float32)
        pad_val = _elementwise_loss(base_loss_fn_str, z, z)     # 0, or log(2) for bce
        per_sample_sum = per_sample_sum - jnp.float32(pad_count) * pad_val

    per_sample_mean = per_sample_sum / jnp.float32(f)
    if weights is None:
        return jnp.mean(per_sample_mean)
    w = weights.reshape(b).astype(jnp.float32)
    return jnp.mean(per_sample_mean * w)


# ----------------------------- reference & tests ------------------------------

def _reference(preds, targets, weights, base_loss_fn_str):
    b = preds.shape[0]
    x = preds.reshape(b, -1).astype(jnp.float32)
    y = targets.reshape(b, -1).astype(jnp.float32)
    ew = _elementwise_loss(base_loss_fn_str, x, y)
    per_sample = jnp.mean(ew, axis=1)
    if weights is None:
        return jnp.mean(per_sample)
    return jnp.mean(per_sample * weights.reshape(b).astype(jnp.float32))


def _check(name, got, ref, ok, rtol=1e-4, atol=1e-6):
    if not jnp.allclose(got, ref, rtol=rtol, atol=atol):
        print(f"MISMATCH {name}: kernel={got} ref={ref}")
        return False
    return ok


if __name__ == "__main__":
    key = jax.random.PRNGKey(0)
    k1, k2, k3 = jax.random.split(key, 3)

    B, C, H, W = 2, 4, 16, 16                      # NCHW, F = 1024 (lane aligned)
    preds = jax.random.normal(k1, (B, C, H, W), dtype=jnp.float32)
    targets = jax.random.normal(k2, (B, C, H, W), dtype=jnp.float32)
    weights = jax.random.uniform(k3, (B,), dtype=jnp.float32)

    ok = True
    for loss_name in ("mse", "l1", "smooth_l1", "bce"):
        tgt = jax.nn.sigmoid(targets) if loss_name == "bce" else targets
        got = jax.block_until_ready(
            weighted_loss(preds, tgt, weights, base_loss_fn_str=loss_name))
        ref = _reference(preds, tgt, weights, loss_name)
        ok = _check(loss_name, got, ref, ok)

    # weights=None path
    got = jax.block_until_ready(weighted_loss(preds, targets, None,
                                              base_loss_fn_str="mse"))
    ok = _check("mse(no weights)", got, _reference(preds, targets, None, "mse"), ok)

    # Non-lane-aligned F (exercises the zero-pad + epilogue correction; matters for bce).
    pm = jax.random.normal(k1, (2, 5, 7, 3), dtype=jnp.float32)   # F = 105
    tm = jax.nn.sigmoid(jax.random.normal(k2, (2, 5, 7, 3), dtype=jnp.float32))
    wm = jax.random.uniform(k3, (2,), dtype=jnp.float32)
    got = jax.block_until_ready(weighted_loss(pm, tm, wm, base_loss_fn_str="bce"))
    ok = _check("bce(F=105)", got, _reference(pm, tm, wm, "bce"), ok)

    # Larger f32 shape with default block size: exercises the strip-mined group loop.
    pf = jax.random.normal(k1, (2, 8, 64, 64), dtype=jnp.float32)  # F = 32768
    tf_ = jax.random.normal(k2, (2, 8, 64, 64), dtype=jnp.float32)
    wf = jax.random.uniform(k3, (2,), dtype=jnp.float32)
    got = jax.block_until_ready(weighted_loss(pf, tf_, wf, base_loss_fn_str="l1"))
    ok = _check("l1(f32, strip-mined)", got, _reference(pf, tf_, wf, "l1"), ok)

    # Small block size: multi-step accumulation + bf16 streaming (packed 16-row tiles).
    pb = pf.astype(jnp.bfloat16)
    tb = tf_.astype(jnp.bfloat16)
    got = jax.block_until_ready(
        weighted_loss(pb, tb, wf, base_loss_fn_str="mse",
                      target_block_bytes=32 * 1024))
    ok = _check("mse(bf16, multi-block)", got, _reference(pb, tb, wf, "mse"), ok,
                rtol=1e-3, atol=1e-6)

    if ok:
        print("KERNEL_OK")
</pallas_src>

<mosaic_0001>
module attributes {stable_mosaic.version = 11 : i64} {
  func.func @_weighted_loss_kernel(%arg0: i32, %arg1: memref<2x8x128xf32, #tpu.memory_space<vmem>>, %arg2: memref<2x8x128xf32, #tpu.memory_space<vmem>>, %arg3: memref<1x2x8x128xf32, #tpu.memory_space<vmem>>, %arg4: memref<2x8x128xf32, #tpu.memory_space<vmem>>) attributes {dimension_semantics = [#tpu.dimension_semantics<arbitrary>], iteration_bounds = array<i64: 1>, scalar_prefetch = 0 : i64, scratch_operands = 1 : i64, tpu.core_type = #tpu.core_type<tc>, window_params = [{transform_indices = @transform_0, window_bounds = array<i64: 2, 8, 128>}, {transform_indices = @transform_1, window_bounds = array<i64: 2, 8, 128>}, {pipeline_mode = #tpu.pipeline_mode<synchronous>, transform_indices = @transform_2, window_bounds = array<i64: 1, 2, 8, 128>}]} {
    %c0_i32 = arith.constant 0 : i32
    %0 = arith.cmpi eq, %arg0, %c0_i32 : i32
    %1 = arith.extui %0 : i1 to i32
    %c0_i32_0 = arith.constant 0 : i32
    %2 = arith.cmpi ne, %1, %c0_i32_0 : i32
    scf.if %2 {
      %cst_14 = arith.constant 0.000000e+00 : f32
      %15 = vector.broadcast %cst_14 : f32 to vector<2x8x128xf32>
      %c0_15 = arith.constant 0 : index
      %c0_16 = arith.constant 0 : index
      %c0_17 = arith.constant 0 : index
      %16 = vector.load %arg4[%c0_15, %c0_16, %c0_17] : memref<2x8x128xf32, #tpu.memory_space<vmem>>, vector<2x8x128xf32>
      tpu.vector_store %arg4[%c0_15, %c0_16, %c0_17], %15 {strides = array<i32>} : memref<2x8x128xf32, #tpu.memory_space<vmem>>, vector<2x8x128xf32>,
    } else {
    }
    %c0 = arith.constant 0 : index
    %c0_1 = arith.constant 0 : index
    %c0_2 = arith.constant 0 : index
    %3 = vector.load %arg1[%c0, %c0_1, %c0_2] : memref<2x8x128xf32, #tpu.memory_space<vmem>>, vector<2x8x128xf32>
    %c0_3 = arith.constant 0 : index
    %c0_4 = arith.constant 0 : index
    %c0_5 = arith.constant 0 : index
    %4 = vector.load %arg2[%c0_3, %c0_4, %c0_5] : memref<2x8x128xf32, #tpu.memory_space<vmem>>, vector<2x8x128xf32>
    %5 = arith.subf %3, %4 : vector<2x8x128xf32>
    %6 = arith.mulf %5, %5 : vector<2x8x128xf32>
    %c0_6 = arith.constant 0 : index
    %c0_7 = arith.constant 0 : index
    %c0_8 = arith.constant 0 : index
    %7 = vector.load %arg4[%c0_6, %c0_7, %c0_8] : memref<2x8x128xf32, #tpu.memory_space<vmem>>, vector<2x8x128xf32>
    %8 = vector.shape_cast %6 : vector<2x8x128xf32> to vector<2x1x8x128xf32>
    %cst = arith.constant dense<0.000000e+00> : vector<2x8x128xf32>
    %9 = vector.multi_reduction <add>, %8, %cst [1] : vector<2x1x8x128xf32> to vector<2x8x128xf32>
    %10 = arith.addf %7, %9 : vector<2x8x128xf32>
    %c0_9 = arith.constant 0 : index
    %c0_10 = arith.constant 0 : index
    %c0_11 = arith.constant 0 : index
    %11 = vector.load %arg4[%c0_9, %c0_10, %c0_11] : memref<2x8x128xf32, #tpu.memory_space<vmem>>, vector<2x8x128xf32>
    tpu.vector_store %arg4[%c0_9, %c0_10, %c0_11], %10 {strides = array<i32>} : memref<2x8x128xf32, #tpu.memory_space<vmem>>, vector<2x8x128xf32>,
    %c0_i32_12 = arith.constant 0 : i32
    %12 = arith.cmpi eq, %arg0, %c0_i32_12 : i32
    %13 = arith.extui %12 : i1 to i32
    %c0_i32_13 = arith.constant 0 : i32
    %14 = arith.cmpi ne, %13, %c0_i32_13 : i32
    scf.if %14 {
      %c0_14 = arith.constant 0 : index
      %c0_15 = arith.constant 0 : index
      %c0_16 = arith.constant 0 : index
      %15 = vector.load %arg4[%c0_14, %c0_15, %c0_16] : memref<2x8x128xf32, #tpu.memory_space<vmem>>, vector<2x8x128xf32>
      %16 = vector.shape_cast %15 : vector<2x8x128xf32> to vector<1x2x8x128xf32>
      %c0_17 = arith.constant 0 : index
      %c0_18 = arith.constant 0 : index
      %c0_19 = arith.constant 0 : index
      %c0_20 = arith.constant 0 : index
      %17 = vector.load %arg3[%c0_17, %c0_18, %c0_19, %c0_20] : memref<1x2x8x128xf32, #tpu.memory_space<vmem>>, vector<1x2x8x128xf32>
      tpu.vector_store %arg3[%c0_17, %c0_18, %c0_19, %c0_20], %16 {strides = array<i32>} : memref<1x2x8x128xf32, #tpu.memory_space<vmem>>, vector<1x2x8x128xf32>,
    } else {
    }
    return
  }
  func.func @transform_0(%arg0: i32) -> (i32, i32, i32) {
    %c0_i32 = arith.constant 0 : i32
    %c0_i32_0 = arith.constant 0 : i32
    %c0_i32_1 = arith.constant 0 : i32
    return %c0_i32, %arg0, %c0_i32_0 : i32, i32, i32
  }
  func.func @transform_1(%arg0: i32) -> (i32, i32, i32) {
    %c0_i32 = arith.constant 0 : i32
    %c0_i32_0 = arith.constant 0 : i32
    %c0_i32_1 = arith.constant 0 : i32
    return %c0_i32, %arg0, %c0_i32_0 : i32, i32, i32
  }
  func.func @transform_2(%arg0: i32) -> (i32, i32, i32, i32) {
    %c0_i32 = arith.constant 0 : i32
    %c0_i32_0 = arith.constant 0 : i32
    %c0_i32_1 = arith.constant 0 : i32
    %c0_i32_2 = arith.constant 0 : i32
    %c0_i32_3 = arith.constant 0 : i32
    return %c0_i32, %c0_i32_0, %c0_i32_1, %c0_i32_2 : i32, i32, i32, i32
  }
}

</mosaic_0001>

<bundles_post_ra>
// kernel: tpu_custom_call.1
= control target key start
LH: loop header
LB: loop body
LE: loop exit
PB: predicated region body
PF: predicated region fallthrough
CT: control target
= control target key end

     0   :  { %7 = vsyncpa [#allocation4], 0  ;;  %s214_s0 = inlined_call_operand.hbm [shape: f32[2,8,128], index: 0, kind: input, shape index: {}]   ;;  %s215_s1 = inlined_call_operand.hbm [shape: f32[2,8,128], index: 1, kind: input, shape index: {}]   ;;  %s216_s2 = inlined_call_operand.hbm [shape: f32[1,2,8,128], index: 2, kind: output, shape index: {}]  }
   0x1   :  { %8 = vsyncpa [#allocation7], 0 }
   0x2   :  { %9 = vsyncpa [#allocation5], 0  ;;  %s14_s11 = sshll.u32 %s214_s0, 4  ;;  %s176_s12 = smov [#allocation3]   ;;  %s15_s11 = int_to_ptr.hbm [resolvable:$true] %s14_s11 }
   0x3   :  { %s16_s13 = sshll.u32 %s176_s12, 4  ;;  %s27_s16 = sshll.u32 %s215_s1, 4  ;;  %s17_s13 = int_to_ptr.vmem [resolvable:$true] %s16_s13  ;;  %s28_s16 = int_to_ptr.hbm [resolvable:$true] %s27_s16 }
   0x4   :  { %s177_s17 = smov 128   ;;  %s178_s18 = smov 8  }
   0x5   :  { %22 = dma.hbm_to_vmem [thread:$0]  %s15_s11, 256, %s17_s13, [#allocation4], %s177_s17, %s177_s17, %s178_s18  }
   0x6   :  { %s179_s19 = smov [#allocation6]  }
   0x7   :  { %s29_s20 = sshll.u32 %s179_s19, 4  ;;  %s30_s20 = int_to_ptr.vmem [resolvable:$true] %s29_s20 }
   0x8   :  { %35 = dma.hbm_to_vmem [thread:$0]  %s28_s16, 256, %s30_s20, [#allocation7], %s177_s17, %s177_s17, %s178_s18  }
   0x9   :  { %170 = dma.done.wait [#allocation4], 256  }
   0xa   :  { %171 = vsyncadd [#allocation4], 4294967040 }
   0xb   :  { %172 = dma.done.wait [#allocation7], 256  }
   0xc   :  { %173 = vsyncadd [#allocation7], 4294967040  ;;  %v50_v0 = vld [vmem:[#allocation3] sm:$0xff]  ;;  %v52_v1 = vld [vmem:[#allocation6] sm:$0xff]  ;;  %s180_s0 = smov [#allocation8]   ;;  %s79_s23 = sshll.u32 %s216_s2, 4  ;;  %s80_s23 = int_to_ptr.hbm [resolvable:$true] %s79_s23 }
   0xd   :  { %v51_v2 = vld [vmem:[#allocation3 + $0x8] sm:$0xff]  ;;  %v54_v3 = vsub.f32 %v50_v0, %v52_v1  ;;  %v53_v4 = vld [vmem:[#allocation6 + $0x8] sm:$0xff]  ;;  %s77_s1 = sshll.u32 %s180_s0, 4  ;;  %s78_s1 = int_to_ptr.vmem [resolvable:$true] %s77_s1 }
   0xe   :  { %v55_v5 = vsub.f32 %v51_v2, %v53_v4 }
   0xf   :  { %v56_v6 = vmul.f32 %v54_v3, %v54_v3 }
  0x10   :  { %v57_v7 = vmul.f32 %v55_v5, %v55_v5 }
  0x11   :  { %71 = vst [vmem:[#allocation8] sm:$0xff] %v56_v6 }
  0x12   :  { %72 = vst [vmem:[#allocation8 + $0x8] sm:$0xff] %v57_v7 }
  0x13   :  { %85 = dma.vmem_to_hbm [thread:$0]  %s78_s1, 256, %s80_s23, [#allocation5], %s177_s17, %s177_s17, %s178_s18  }
  0x14   :  { %174 = dma.done.wait [#allocation5], 256  }
  0x15   :  { %175 = vsyncadd [#allocation5], 4294967040 }
  0x16   :  { %90 = vsyncpa [#allocation4], 1 }
  0x17   :  { %91 = vsyncpa [#allocation7], 1 }
  0x18   :  { %92 = vsyncpa [#allocation5], 1 }

</bundles_post_ra>
